<compile_context>
chip_gen: v6e
topology: v6e:2x2x1
jax: 0.10.0
libtpu: 0.0.40
codegen_flags: <defaults>
</compile_context>

<pallas_src>
import jax
import jax.numpy as jnp
from jax.experimental import pallas as pl
from jax.experimental.pallas import tpu as pltpu

INPUT_SIZE = 100
HIDDEN_SIZE = 256
OUTPUT_SIZE = 10


def mlp_kernel(x_ref, w1_ref, b1_ref, w2_ref, b2_ref, w3_ref, b3_ref, o_ref):
    cdt = w1_ref.dtype  # matmul-input dtype (bf16 or f32); accumulation is f32
    x = x_ref[...].astype(cdt)
    # Layer 1: Linear + ReLU (MXU matmul, K=100 masked by Mosaic; f32 bias/ReLU)
    h1 = jnp.dot(x, w1_ref[...], preferred_element_type=jnp.float32)
    h1 = jnp.maximum(h1 + b1_ref[...], 0.0)
    # Layer 2: Linear + ReLU
    h2 = jnp.dot(h1.astype(cdt), w2_ref[...], preferred_element_type=jnp.float32)
    h2 = jnp.maximum(h2 + b2_ref[...], 0.0)
    # Layer 3: Linear (no activation); output written 10 lanes wide (no padding)
    out = jnp.dot(h2.astype(cdt), w3_ref[...], preferred_element_type=jnp.float32)
    o_ref[...] = (out + b3_ref[...]).astype(o_ref.dtype)


def _round_up(n, m):
    return ((n + m - 1) // m) * m


def _pick_batch_tile(batch, max_tile=1024):
    """Batch tile: large enough to amortize per-grid-step overhead, small
    enough to avoid redundant compute on tiny batches, and (given enough work)
    producing >= 2 grid steps so v7x's 2 TensorCores both run."""
    b8 = _round_up(batch, 8)
    if b8 <= max_tile:
        if b8 >= 512:  # enough work to split across 2 TCs (v7x)
            return _round_up(pl.cdiv(b8, 2), 8)
        return b8      # single small step; no padded-batch waste
    return max_tile


def prepare_params(params, weight_dtype=jnp.bfloat16):
    """One-time (hoisted out of the forward hot path) weight/bias prep.
    bf16 weights recommended on all generations; biases stay f32."""
    w1, b1, w2, b2, w3, b3 = params
    return (w1.astype(weight_dtype), b1.astype(jnp.float32),
            w2.astype(weight_dtype), b2.astype(jnp.float32),
            w3.astype(weight_dtype), b3.astype(jnp.float32))


def mock_model_forward(x, kernel_params, *, max_batch_tile=1024):
    """Fused MLP forward on kernel-ready params from prepare_params()."""
    w1, b1, w2, b2, w3, b3 = kernel_params
    B = x.shape[0]
    tile = _pick_batch_tile(B, max_batch_tile)
    n_steps = pl.cdiv(B, tile)

    def full_spec(shape):
        nd = len(shape)
        return pl.BlockSpec(shape, lambda i, _nd=nd: (0,) * _nd)

    wbytes = jnp.dtype(w1.dtype).itemsize
    rows = n_steps * tile  # includes the (masked) remainder rows of the last block
    cost = pl.CostEstimate(
        flops=2 * rows * (INPUT_SIZE * HIDDEN_SIZE
                          + HIDDEN_SIZE * HIDDEN_SIZE
                          + HIDDEN_SIZE * OUTPUT_SIZE),
        transcendentals=0,
        bytes_accessed=(B * INPUT_SIZE * 4
                        + B * OUTPUT_SIZE * 4
                        + (w1.size + w2.size + w3.size) * wbytes
                        + (b1.size + b2.size + b3.size) * 4),
    )

    out = pl.pallas_call(
        mlp_kernel,
        out_shape=jax.ShapeDtypeStruct((B, OUTPUT_SIZE), jnp.float32),
        grid_spec=pltpu.PrefetchScalarGridSpec(
            num_scalar_prefetch=0,
            grid=(n_steps,),
            in_specs=[
                pl.BlockSpec((tile, INPUT_SIZE), lambda i: (i, 0)),
                full_spec(w1.shape), full_spec(b1.shape),
                full_spec(w2.shape), full_spec(b2.shape),
                full_spec(w3.shape), full_spec(b3.shape),
            ],
            out_specs=pl.BlockSpec((tile, OUTPUT_SIZE), lambda i: (i, 0)),
        ),
        compiler_params=pltpu.CompilerParams(
            dimension_semantics=("parallel",),  # shard batch steps across v7x's 2 TCs
        ),
        cost_estimate=cost,
    )(x, w1, b1, w2, b2, w3, b3)
    return out


def init_params(key):
    """Deterministic parameter init (uniform fan-in scaling, like nn.Linear)."""
    ks = jax.random.split(key, 6)

    def linear(kw, kb, fan_in, fan_out):
        bound = 1.0 / jnp.sqrt(fan_in)
        w = jax.random.uniform(kw, (fan_in, fan_out), jnp.float32, -bound, bound)
        # biases kept 2-D (1, out) for clean TPU lane layout / broadcasting
        b = jax.random.uniform(kb, (1, fan_out), jnp.float32, -bound, bound)
        return w, b

    w1, b1 = linear(ks[0], ks[1], INPUT_SIZE, HIDDEN_SIZE)
    w2, b2 = linear(ks[2], ks[3], HIDDEN_SIZE, HIDDEN_SIZE)
    w3, b3 = linear(ks[4], ks[5], HIDDEN_SIZE, OUTPUT_SIZE)
    return (w1, b1, w2, b2, w3, b3)


def reference_forward(x, params):
    w1, b1, w2, b2, w3, b3 = params
    h1 = jnp.maximum(x @ w1 + b1, 0.0)
    h2 = jnp.maximum(h1 @ w2 + b2, 0.0)
    return h2 @ w3 + b3


if __name__ == "__main__":
    key = jax.random.PRNGKey(0)
    k_param, k_x, k_x2 = jax.random.split(key, 3)

    params = init_params(k_param)

    # --- small batch, f32 path (exactness check, single grid step) ----------
    batch = 16
    x = jax.random.normal(k_x, (batch, INPUT_SIZE), jnp.float32)
    ref = reference_forward(x, params)

    p_f32 = prepare_params(params, weight_dtype=jnp.float32)
    out = jax.block_until_ready(mock_model_forward(x, p_f32))
    assert out.shape == (batch, OUTPUT_SIZE)
    assert jnp.allclose(out, ref, atol=1e-4, rtol=1e-4), "f32 mismatch vs reference"

    # --- small batch, bf16 fast path (recommended default on v5e/v6e/v7x) ---
    p_bf16 = prepare_params(params, weight_dtype=jnp.bfloat16)
    out_bf16 = jax.block_until_ready(mock_model_forward(x, p_bf16))
    assert out_bf16.shape == (batch, OUTPUT_SIZE)
    assert jnp.allclose(out_bf16, ref, atol=5e-2, rtol=5e-2), "bf16 mismatch vs reference"

    # --- larger, non-divisible batch: exercises multi-step grid + masked tail
    batch2 = 520  # tile=264 -> 2 grid steps, last block has 8 masked rows
    x2 = jax.random.normal(k_x2, (batch2, INPUT_SIZE), jnp.float32)
    ref2 = reference_forward(x2, params)
    out2 = jax.block_until_ready(mock_model_forward(x2, p_f32))
    assert out2.shape == (batch2, OUTPUT_SIZE)
    assert jnp.allclose(out2, ref2, atol=1e-4, rtol=1e-4), "f32 multi-step mismatch"

    print("KERNEL_OK")
</pallas_src>

<mosaic_0001>
module attributes {stable_mosaic.version = 11 : i64} {
  func.func @mlp_kernel(%arg0: i32, %arg1: memref<16x100xf32, #tpu.memory_space<vmem>>, %arg2: memref<100x256xf32, #tpu.memory_space<vmem>>, %arg3: memref<1x256xf32, #tpu.memory_space<vmem>>, %arg4: memref<256x256xf32, #tpu.memory_space<vmem>>, %arg5: memref<1x256xf32, #tpu.memory_space<vmem>>, %arg6: memref<256x10xf32, #tpu.memory_space<vmem>>, %arg7: memref<1x10xf32, #tpu.memory_space<vmem>>, %arg8: memref<16x10xf32, #tpu.memory_space<vmem>>) attributes {dimension_semantics = [#tpu.dimension_semantics<parallel>], iteration_bounds = array<i64: 1>, scalar_prefetch = 0 : i64, scratch_operands = 0 : i64, tpu.core_type = #tpu.core_type<tc>, window_params = [{transform_indices = @transform_0, window_bounds = array<i64: 16, 100>}, {pipeline_mode = #tpu.pipeline_mode<synchronous>, transform_indices = @transform_1, window_bounds = array<i64: 100, 256>}, {pipeline_mode = #tpu.pipeline_mode<synchronous>, transform_indices = @transform_2, window_bounds = array<i64: 1, 256>}, {pipeline_mode = #tpu.pipeline_mode<synchronous>, transform_indices = @transform_3, window_bounds = array<i64: 256, 256>}, {pipeline_mode = #tpu.pipeline_mode<synchronous>, transform_indices = @transform_4, window_bounds = array<i64: 1, 256>}, {pipeline_mode = #tpu.pipeline_mode<synchronous>, transform_indices = @transform_5, window_bounds = array<i64: 256, 10>}, {pipeline_mode = #tpu.pipeline_mode<synchronous>, transform_indices = @transform_6, window_bounds = array<i64: 1, 10>}, {transform_indices = @transform_7, window_bounds = array<i64: 16, 10>}]} {
    %c0 = arith.constant 0 : index
    %c0_0 = arith.constant 0 : index
    %0 = vector.load %arg1[%c0, %c0_0] : memref<16x100xf32, #tpu.memory_space<vmem>>, vector<16x100xf32>
    %c0_1 = arith.constant 0 : index
    %c0_2 = arith.constant 0 : index
    %1 = vector.load %arg2[%c0_1, %c0_2] : memref<100x256xf32, #tpu.memory_space<vmem>>, vector<100x256xf32>
    %cst = arith.constant dense<0.000000e+00> : vector<16x256xf32>
    %2 = tpu.matmul %0, %1, %cst {dimension_numbers = #tpu.dot_dimension_numbers<[1], [0], [0], [1], [0, 0, 1, 1], [], []>} : vector<16x100xf32>, vector<100x256xf32>, vector<16x256xf32> -> vector<16x256xf32>
    %c0_3 = arith.constant 0 : index
    %c0_4 = arith.constant 0 : index
    %3 = vector.load %arg3[%c0_3, %c0_4] : memref<1x256xf32, #tpu.memory_space<vmem>>, vector<1x256xf32>
    %4 = vector.broadcast %3 : vector<1x256xf32> to vector<16x256xf32>
    %5 = arith.addf %2, %4 : vector<16x256xf32>
    %cst_5 = arith.constant 0.000000e+00 : f32
    %6 = vector.broadcast %cst_5 : f32 to vector<16x256xf32>
    %7 = arith.maximumf %5, %6 : vector<16x256xf32>
    %c0_6 = arith.constant 0 : index
    %c0_7 = arith.constant 0 : index
    %8 = vector.load %arg4[%c0_6, %c0_7] : memref<256x256xf32, #tpu.memory_space<vmem>>, vector<256x256xf32>
    %cst_8 = arith.constant dense<0.000000e+00> : vector<16x256xf32>
    %9 = tpu.matmul %7, %8, %cst_8 {dimension_numbers = #tpu.dot_dimension_numbers<[1], [0], [0], [1], [0, 0, 1, 1], [], []>} : vector<16x256xf32>, vector<256x256xf32>, vector<16x256xf32> -> vector<16x256xf32>
    %c0_9 = arith.constant 0 : index
    %c0_10 = arith.constant 0 : index
    %10 = vector.load %arg5[%c0_9, %c0_10] : memref<1x256xf32, #tpu.memory_space<vmem>>, vector<1x256xf32>
    %11 = vector.broadcast %10 : vector<1x256xf32> to vector<16x256xf32>
    %12 = arith.addf %9, %11 : vector<16x256xf32>
    %cst_11 = arith.constant 0.000000e+00 : f32
    %13 = vector.broadcast %cst_11 : f32 to vector<16x256xf32>
    %14 = arith.maximumf %12, %13 : vector<16x256xf32>
    %c0_12 = arith.constant 0 : index
    %c0_13 = arith.constant 0 : index
    %15 = vector.load %arg6[%c0_12, %c0_13] : memref<256x10xf32, #tpu.memory_space<vmem>>, vector<256x10xf32>
    %cst_14 = arith.constant dense<0.000000e+00> : vector<16x10xf32>
    %16 = tpu.matmul %14, %15, %cst_14 {dimension_numbers = #tpu.dot_dimension_numbers<[1], [0], [0], [1], [0, 0, 1, 1], [], []>} : vector<16x256xf32>, vector<256x10xf32>, vector<16x10xf32> -> vector<16x10xf32>
    %c0_15 = arith.constant 0 : index
    %c0_16 = arith.constant 0 : index
    %17 = vector.load %arg7[%c0_15, %c0_16] : memref<1x10xf32, #tpu.memory_space<vmem>>, vector<1x10xf32>
    %18 = vector.broadcast %17 : vector<1x10xf32> to vector<16x10xf32>
    %19 = arith.addf %16, %18 : vector<16x10xf32>
    %c0_17 = arith.constant 0 : index
    %c0_18 = arith.constant 0 : index
    %20 = vector.load %arg8[%c0_17, %c0_18] : memref<16x10xf32, #tpu.memory_space<vmem>>, vector<16x10xf32>
    tpu.vector_store %arg8[%c0_17, %c0_18], %19 {strides = array<i32>} : memref<16x10xf32, #tpu.memory_space<vmem>>, vector<16x10xf32>,
    return
  }
  func.func @transform_0(%arg0: i32) -> (i32, i32) {
    %c0_i32 = arith.constant 0 : i32
    %c0_i32_0 = arith.constant 0 : i32
    return %arg0, %c0_i32 : i32, i32
  }
  func.func @transform_1(%arg0: i32) -> (i32, i32) {
    %c0_i32 = arith.constant 0 : i32
    %c0_i32_0 = arith.constant 0 : i32
    %c0_i32_1 = arith.constant 0 : i32
    return %c0_i32, %c0_i32_0 : i32, i32
  }
  func.func @transform_2(%arg0: i32) -> (i32, i32) {
    %c0_i32 = arith.constant 0 : i32
    %c0_i32_0 = arith.constant 0 : i32
    %c0_i32_1 = arith.constant 0 : i32
    return %c0_i32, %c0_i32_0 : i32, i32
  }
  func.func @transform_3(%arg0: i32) -> (i32, i32) {
    %c0_i32 = arith.constant 0 : i32
    %c0_i32_0 = arith.constant 0 : i32
    %c0_i32_1 = arith.constant 0 : i32
    return %c0_i32, %c0_i32_0 : i32, i32
  }
  func.func @transform_4(%arg0: i32) -> (i32, i32) {
    %c0_i32 = arith.constant 0 : i32
    %c0_i32_0 = arith.constant 0 : i32
    %c0_i32_1 = arith.constant 0 : i32
    return %c0_i32, %c0_i32_0 : i32, i32
  }
  func.func @transform_5(%arg0: i32) -> (i32, i32) {
    %c0_i32 = arith.constant 0 : i32
    %c0_i32_0 = arith.constant 0 : i32
    %c0_i32_1 = arith.constant 0 : i32
    return %c0_i32, %c0_i32_0 : i32, i32
  }
  func.func @transform_6(%arg0: i32) -> (i32, i32) {
    %c0_i32 = arith.constant 0 : i32
    %c0_i32_0 = arith.constant 0 : i32
    %c0_i32_1 = arith.constant 0 : i32
    return %c0_i32, %c0_i32_0 : i32, i32
  }
  func.func @transform_7(%arg0: i32) -> (i32, i32) {
    %c0_i32 = arith.constant 0 : i32
    %c0_i32_0 = arith.constant 0 : i32
    return %arg0, %c0_i32 : i32, i32
  }
}

</mosaic_0001>

<bundles_post_ra>
// kernel: tpu_custom_call.1
= control target key start
LH: loop header
LB: loop body
LE: loop exit
PB: predicated region body
PF: predicated region fallthrough
CT: control target
= control target key end

     0   :  { %12 = vsyncpa [#allocation3], 0  ;;  %s807_s0 = inlined_call_operand.vmem [shape: f32[16,100], index: 0, kind: input, shape index: {}]   ;;  %s808_s1 = inlined_call_operand.vmem [shape: f32[100,256], index: 1, kind: input, shape index: {}]   ;;  %s809_s2 = inlined_call_operand.vmem [shape: f32[1,256], index: 2, kind: input, shape index: {}]   ;;  %s810_s3 = inlined_call_operand.hbm [shape: f32[256,256], index: 3, kind: input, shape index: {}]   ;;  %s811_s4 = inlined_call_operand.vmem [shape: f32[1,256], index: 4, kind: input, shape index: {}]   ;;  %s812_s5 = inlined_call_operand.vmem [shape: f32[256,10], index: 5, kind: input, shape index: {}]   ;;  %s813_s6 = inlined_call_operand.vmem [shape: f32[1,10], index: 6, kind: input, shape index: {}]   ;;  %s814_s7 = inlined_call_operand.hbm [shape: f32[16,10], index: 7, kind: output, shape index: {}]  }
   0x1   :  { %13 = vsyncpa [#allocation4], 0  ;;  %s561_s24 = smov [#allocation2]  }
   0x2   :  { %s25_s25 = sshll.u32 %s561_s24, 4  ;;  %s26_s25 = int_to_ptr.vmem [resolvable:$true] %s25_s25 }
   0x3   :  { %s525_s26 = scalar_lea.vmem %s26_s25, 8192  ;;  %p530_p1 = scmp.lt.s32.totalorder %s26_s25, %s26_s25 }
   0x4   :  { %p526_p0 = scmp.ne.s32.totalorder %s26_s25, %s525_s26  ;;  %p531_p2 = scmp.lt.s32.totalorder %s525_s26, %s525_s26 }
   0x6   :  { %p532_p3 = por %p531_p2, %p530_p1 }
   0x8   :  { %p533_p4 = pnand %p532_p3, %p526_p0 }
   0xa   :  { %536 = shalt.err (!%p533_p4)
}
   0xb   :  { %s562_s27 = smov 256   ;;  %s563_s28 = smov 16  }
   0xc   :  { %31 = dma.hbm_to_vmem [thread:$0]  %s810_s3, 8192, %s26_s25, [#allocation3], %s562_s27, %s562_s27, %s563_s28  }
   0xd   :  { %557 = dma.done.wait [#allocation3], 8192  }
   0xe   :  { %558 = vsyncadd [#allocation3], 4294959104  ;;  %v564_v0 = vmov 0.0   ;;  %vm88_vm0 = vcmask 1043456   ;;  %v68_v1 = vld [vmem:[%s808_s1 + $0xc8] sm:$0xf] }
   0xf   :  { %159 = vmatprep.mubr.f32.mxu0 %v564_v0  ;;  %v67_v2 = vld [vmem:[%s808_s1 + $0xc0] sm:$0xf]  ;;  %v66_v3 = vld [vmem:[%s808_s1 + $0xb8] sm:$0xff]  ;;  %467 = vmatprep.subr.msk.mxu0 %vm88_vm0, %v68_v1  ;;  %v65_v4 = vld [vmem:[%s808_s1 + $0xb0] sm:$0xff]  ;;  %vm81_vm1 = vcmask 818176   ;;  %vm447_vm2 = vcmask 80896  }
  0x10   :  { %468 = vmatpush1.msk.msra.mxu0 %vm88_vm0, %v67_v2  ;;  %v64_v5 = vld [vmem:[%s808_s1 + $0xa8] sm:$0xff]  ;;  %v63_v6 = vld [vmem:[%s808_s1 + $0xa0] sm:$0xff]  ;;  %v62_v7 = vld [vmem:[%s808_s1 + $0x98] sm:$0xff]  ;;  %s565_s28 = smov [#allocation5]  }
  0x11   :  { %103 = vmatprep.subr.mxu0 %v66_v3  ;;  %v61_v8 = vld [vmem:[%s808_s1 + $0x90] sm:$0xff]  ;;  %v60_v9 = vld [vmem:[%s808_s1 + $0x88] sm:$0xff]  ;;  %v59_v10 = vld [vmem:[%s808_s1 + $0x80] sm:$0xff]  ;;  %s455_s29 = sshll.u32 %s565_s28, 4  ;;  %s456_s29 = int_to_ptr.vmem [resolvable:$true] %s455_s29 }
  0x12   :  { %104 = vmatpush1.msra.mxu0 %v65_v4  ;;  %v58_v11 = vld [vmem:[%s808_s1 + $0x78] sm:$0xff]  ;;  %v57_v12 = vld [vmem:[%s808_s1 + $0x70] sm:$0xff]  ;;  %v56_v15 = vld [vmem:[%s808_s1 + $0x68] sm:$0xff]  ;;  %s537_s30 = scalar_lea.vmem %s456_s29, 256  ;;  %p542_p6 = scmp.lt.s32.totalorder %s456_s29, %s456_s29 }
  0x13   :  { %105 = vmatprep.subr.mxu0 %v64_v5  ;;  %v207_v13 = vld [vmem:[#allocation2 + $0xf8] sm:$0xff]  ;;  %v206_v14 = vld [vmem:[#allocation2 + $0xf0] sm:$0xff]  ;;  %v205_v16 = vld [vmem:[#allocation2 + $0xe8] sm:$0xff]  ;;  %p538_p5 = scmp.ne.s32.totalorder %s456_s29, %s537_s30  ;;  %p543_p7 = scmp.lt.s32.totalorder %s537_s30, %s537_s30 }
  0x14   :  { %106 = vmatpush1.msra.mxu0 %v63_v6  ;;  %252 = vmatprep.subr.mxu1 %v207_v13  ;;  %v204_v17 = vld [vmem:[#allocation2 + $0xe0] sm:$0xff]  ;;  %v203_v19 = vld [vmem:[#allocation2 + $0xd8] sm:$0xff]  ;;  %v202_v21 = vld [vmem:[#allocation2 + $0xd0] sm:$0xff] }
  0x15   :  { %107 = vmatprep.subr.mxu0 %v62_v7  ;;  %v55_v18 = vld [vmem:[%s808_s1 + $0x60] sm:$0xff]  ;;  %253 = vmatpush1.msra.mxu1 %v206_v14  ;;  %v54_v20 = vld [vmem:[%s808_s1 + $0x58] sm:$0xff]  ;;  %v53_v22 = vld [vmem:[%s808_s1 + $0x50] sm:$0xff]  ;;  %p544_p8 = por %p543_p7, %p542_p6 }
  0x16   :  { %108 = vmatpush1.msra.mxu0 %v61_v8  ;;  %254 = vmatprep.subr.mxu1 %v205_v16  ;;  %v201_v23 = vld [vmem:[#allocation2 + $0xc8] sm:$0xff]  ;;  %v200_v25 = vld [vmem:[#allocation2 + $0xc0] sm:$0xff]  ;;  %v199_v27 = vld [vmem:[#allocation2 + $0xb8] sm:$0xff] }
  0x17   :  { %109 = vmatprep.subr.mxu0 %v60_v9  ;;  %255 = vmatpush1.msra.mxu1 %v204_v17  ;;  %v52_v24 = vld [vmem:[%s808_s1 + $0x48] sm:$0xff]  ;;  %v51_v26 = vld [vmem:[%s808_s1 + $0x40] sm:$0xff]  ;;  %v50_v28 = vld [vmem:[%s808_s1 + $0x38] sm:$0xff]  ;;  %p545_p9 = pnand %p544_p8, %p538_p5 }
  0x18   :  { %110 = vmatpush1.msra.mxu0 %v59_v10  ;;  %256 = vmatprep.subr.mxu1 %v203_v19  ;;  %v198_v29 = vld [vmem:[#allocation2 + $0xb0] sm:$0xff]  ;;  %v197_v31 = vld [vmem:[#allocation2 + $0xa8] sm:$0xff]  ;;  %v196_v33 = vld [vmem:[#allocation2 + $0xa0] sm:$0xff] }
  0x19   :  { %111 = vmatprep.subr.mxu0 %v58_v11  ;;  %257 = vmatpush1.msra.mxu1 %v202_v21  ;;  %v49_v30 = vld [vmem:[%s808_s1 + $0x30] sm:$0xff]  ;;  %v48_v32 = vld [vmem:[%s808_s1 + $0x28] sm:$0xff]  ;;  %v47_v34 = vld [vmem:[%s808_s1 + $0x20] sm:$0xff] }
  0x1a   :  { %112 = vmatpush1.msra.mxu0 %v57_v12  ;;  %258 = vmatprep.subr.mxu1 %v201_v23  ;;  %v195_v35 = vld [vmem:[#allocation2 + $0x98] sm:$0xff]  ;;  %v194_v37 = vld [vmem:[#allocation2 + $0x90] sm:$0xff]  ;;  %v193_v39 = vld [vmem:[#allocation2 + $0x88] sm:$0xff] }
  0x1b   :  { %113 = vmatprep.subr.mxu0 %v56_v15  ;;  %259 = vmatpush1.msra.mxu1 %v200_v25  ;;  %v46_v36 = vld [vmem:[%s808_s1 + $0x18] sm:$0xff]  ;;  %v45_v38 = vld [vmem:[%s808_s1 + $0x10] sm:$0xff]  ;;  %v44_v40 = vld [vmem:[%s808_s1 + $0x8] sm:$0xff] }
  0x1c   :  { %114 = vmatpush1.msra.mxu0 %v55_v18  ;;  %260 = vmatprep.subr.mxu1 %v199_v27  ;;  %v192_v41 = vld [vmem:[#allocation2 + $0x80] sm:$0xff]  ;;  %v191_v43 = vld [vmem:[#allocation2 + $0x78] sm:$0xff]  ;;  %v190_v45 = vld [vmem:[#allocation2 + $0x70] sm:$0xff] }
  0x1d   :  { %115 = vmatprep.subr.mxu0 %v54_v20  ;;  %261 = vmatpush1.msra.mxu1 %v198_v29  ;;  %v43_v42 = vld [vmem:[%s808_s1] sm:$0xff]  ;;  %v189_v46 = vld [vmem:[#allocation2 + $0x68] sm:$0xff]  ;;  %v187_v48 = vld [vmem:[#allocation2 + $0x58] sm:$0xff] }
  0x1e   :  { %116 = vmatpush1.msra.mxu0 %v53_v22  ;;  %262 = vmatprep.subr.mxu1 %v197_v31  ;;  %v41_v44 = vld [vmem:[%s807_s0] sm:$0xff]  ;;  %v42_v49 = vld [vmem:[%s807_s0 + $0x8] sm:$0xff]  ;;  %v186_v50 = vld [vmem:[#allocation2 + $0x50] sm:$0xff] }
  0x1f   :  { %117 = vmatprep.subr.mxu0 %v52_v24  ;;  %263 = vmatpush1.msra.mxu1 %v196_v33  ;;  %v188_v47 = vld [vmem:[#allocation2 + $0x60] sm:$0xff]  ;;  %v185_v51 = vld [vmem:[#allocation2 + $0x48] sm:$0xff]  ;;  %v183_v53 = vld [vmem:[#allocation2 + $0x38] sm:$0xff] }
  0x20   :  { %118 = vmatpush1.msra.mxu0 %v51_v26  ;;  %264 = vmatprep.subr.mxu1 %v195_v35  ;;  %v184_v52 = vld [vmem:[#allocation2 + $0x40] sm:$0xff]  ;;  %v182_v54 = vld [vmem:[#allocation2 + $0x30] sm:$0xff]  ;;  %v181_v55 = vld [vmem:[#allocation2 + $0x28] sm:$0xff] }
  0x21   :  { %119 = vmatprep.subr.mxu0 %v50_v28  ;;  %265 = vmatpush1.msra.mxu1 %v194_v37  ;;  %v180_v56 = vld [vmem:[#allocation2 + $0x20] sm:$0xff]  ;;  %v179_v57 = vld [vmem:[#allocation2 + $0x18] sm:$0xff]  ;;  %v178_v58 = vld [vmem:[#allocation2 + $0x10] sm:$0xff] }
  0x22   :  { %120 = vmatpush1.msra.mxu0 %v49_v30  ;;  %266 = vmatprep.subr.mxu1 %v193_v39  ;;  %v177_v59 = vld [vmem:[#allocation2 + $0x8] sm:$0xff]  ;;  %v176_v60 = vld [vmem:[#allocation2] sm:$0xff]  ;;  %v239_v61 = vld [vmem:[#allocation2 + $0x1f8] sm:$0xff] }
  0x23   :  { %121 = vmatprep.subr.mxu0 %v48_v32  ;;  %267 = vmatpush1.msra.mxu1 %v192_v41  ;;  %v238_v62 = vld [vmem:[#allocation2 + $0x1f0] sm:$0xff]  ;;  %v237_v63 = vld [vmem:[#allocation2 + $0x1e8] sm:$0xff]  ;;  %v235_v1 = vld [vmem:[#allocation2 + $0x1d8] sm:$0xff] }
  0x24   :  { %122 = vmatpush1.msra.mxu0 %v47_v34  ;;  %268 = vmatprep.subr.mxu1 %v191_v43  ;;  %v234_v2 = vld [vmem:[#allocation2 + $0x1d0] sm:$0xff]  ;;  %v233_v3 = vld [vmem:[#allocation2 + $0x1c8] sm:$0xff]  ;;  %v232_v4 = vld [vmem:[#allocation2 + $0x1c0] sm:$0xff] }
  0x25   :  { %123 = vmatprep.subr.mxu0 %v46_v36  ;;  %269 = vmatpush1.msra.mxu1 %v190_v45  ;;  %v231_v5 = vld [vmem:[#allocation2 + $0x1b8] sm:$0xff]  ;;  %v230_v6 = vld [vmem:[#allocation2 + $0x1b0] sm:$0xff]  ;;  %v229_v7 = vld [vmem:[#allocation2 + $0x1a8] sm:$0xff] }
  0x26   :  { %124 = vmatpush1.msra.mxu0 %v45_v38  ;;  %270 = vmatprep.subr.mxu1 %v189_v46  ;;  %v228_v8 = vld [vmem:[#allocation2 + $0x1a0] sm:$0xff]  ;;  %v227_v9 = vld [vmem:[#allocation2 + $0x198] sm:$0xff]  ;;  %v226_v10 = vld [vmem:[#allocation2 + $0x190] sm:$0xff] }
  0x27   :  { %125 = vmatprep.subr.mxu0 %v44_v40  ;;  %271 = vmatpush1.msra.mxu1 %v188_v47  ;;  %v225_v11 = vld [vmem:[#allocation2 + $0x188] sm:$0xff]  ;;  %v224_v12 = vld [vmem:[#allocation2 + $0x180] sm:$0xff]  ;;  %v223_v13 = vld [vmem:[#allocation2 + $0x178] sm:$0xff] }
  0x28   :  { %126 = vmatpush1.msra.mxu0 %v43_v42  ;;  %272 = vmatprep.subr.mxu1 %v187_v48  ;;  %v222_v14 = vld [vmem:[#allocation2 + $0x170] sm:$0xff]  ;;  %v221_v15 = vld [vmem:[#allocation2 + $0x168] sm:$0xff]  ;;  %v220_v16 = vld [vmem:[#allocation2 + $0x160] sm:$0xff] }
  0x29   :  { %469 = vmatmul.mubr.msk.f32.vlgmr.msra.gmra.mxu0 %vm81_vm1, %v41_v44  ;;  %273 = vmatpush1.msra.mxu1 %v186_v50  ;;  %v219_v17 = vld [vmem:[#allocation2 + $0x158] sm:$0xff]  ;;  %v218_v18 = vld [vmem:[#allocation2 + $0x150] sm:$0xff]  ;;  %v217_v19 = vld [vmem:[#allocation2 + $0x148] sm:$0xff] }
  0x2a   :  { %165 = vmatprep.mubr.f32.mxu0 %v564_v0  ;;  %274 = vmatprep.subr.mxu1 %v185_v51  ;;  %v236_v0 = vld [vmem:[#allocation2 + $0x1e0] sm:$0xff]  ;;  %v215_v21 = vld [vmem:[#allocation2 + $0x138] sm:$0xff]  ;;  %v214_v22 = vld [vmem:[#allocation2 + $0x130] sm:$0xff] }
  0x2b   :  { %275 = vmatpush1.msra.mxu1 %v184_v52  ;;  %v216_v20 = vld [vmem:[#allocation2 + $0x140] sm:$0xff]  ;;  %v213_v23 = vld [vmem:[#allocation2 + $0x128] sm:$0xff]  ;;  %v211_v25 = vld [vmem:[#allocation2 + $0x118] sm:$0xff] }
  0x2c   :  { %276 = vmatprep.subr.mxu1 %v183_v53  ;;  %v212_v24 = vld [vmem:[#allocation2 + $0x120] sm:$0xff]  ;;  %v210_v26 = vld [vmem:[#allocation2 + $0x110] sm:$0xff]  ;;  %v209_v27 = vld [vmem:[#allocation2 + $0x108] sm:$0xff]  ;;  %v71_v53 = vlaneseq }
  0x2d   :  { %470 = vmatmul.mubr.msk.f32.gmra.mxu0 %vm81_vm1, %v42_v49  ;;  %277 = vmatpush1.msra.mxu1 %v182_v54  ;;  %v208_v28 = vld [vmem:[#allocation2 + $0x100] sm:$0xff]  ;;  %v364_v29 = vld [vmem:[%s812_s5 + $0xf8] sm:$0xff]  ;;  %v363_v31 = vld [vmem:[%s812_s5 + $0xf0] sm:$0xff] }
  0x2e   :  { %278 = vmatprep.subr.mxu1 %v181_v55  ;;  %v348_v30 = vld [vmem:[%s812_s5 + $0x78] sm:$0xff]  ;;  %472 = vmatprep.subr.mxu0 %v364_v29  ;;  %v347_v32 = vld [vmem:[%s812_s5 + $0x70] sm:$0xff]  ;;  %v362_v33 = vld [vmem:[%s812_s5 + $0xe8] sm:$0xff]  ;;  %v72_v54 = vshrl.u32 %v71_v53, 7 }
  0x2f   :  { %279 = vmatpush1.msra.mxu1 %v180_v56  ;;  %473 = vmatpush3.msra.mxu0 %v348_v30  ;;  %v346_v34 = vld [vmem:[%s812_s5 + $0x68] sm:$0xff]  ;;  %v361_v35 = vld [vmem:[%s812_s5 + $0xe0] sm:$0xff]  ;;  %v360_v37 = vld [vmem:[%s812_s5 + $0xd8] sm:$0xff] }
  0x30   :  { %280 = vmatprep.subr.mxu1 %v179_v57  ;;  %474 = vmatprep.subr.mxu0 %v363_v31  ;;  %v345_v36 = vld [vmem:[%s812_s5 + $0x60] sm:$0xff]  ;;  %v344_v38 = vld [vmem:[%s812_s5 + $0x58] sm:$0xff]  ;;  %v359_v39 = vld [vmem:[%s812_s5 + $0xd0] sm:$0xff]  ;;  %v73_v55 = vsub.s32 0, %v72_v54  ;;  %v77_v57 = vsub.s32 1, %v72_v54 }
  0x31   :  { %281 = vmatpush1.msra.mxu1 %v178_v58  ;;  %475 = vmatpush3.msra.mxu0 %v347_v32  ;;  %v343_v40 = vld [vmem:[%s812_s5 + $0x50] sm:$0xff]  ;;  %v358_v41 = vld [vmem:[%s812_s5 + $0xc8] sm:$0xff]  ;;  %v357_v43 = vld [vmem:[%s812_s5 + $0xc0] sm:$0xff] }
  0x32   :  { %282 = vmatprep.subr.mxu1 %v177_v59  ;;  %476 = vmatprep.subr.mxu0 %v362_v33  ;;  %v342_v42 = vld [vmem:[%s812_s5 + $0x48] sm:$0xff]  ;;  %v341_v44 = vld [vmem:[%s812_s5 + $0x40] sm:$0xff]  ;;  %v356_v45 = vld [vmem:[%s812_s5 + $0xb8] sm:$0xff] }
  0x33   :  { %283 = vmatpush1.msra.mxu1 %v176_v60  ;;  %477 = vmatpush3.msra.mxu0 %v346_v34  ;;  %v340_v46 = vld [vmem:[%s812_s5 + $0x38] sm:$0xff]  ;;  %v355_v47 = vld [vmem:[%s812_s5 + $0xb0] sm:$0xff]  ;;  %v354_v49 = vld [vmem:[%s812_s5 + $0xa8] sm:$0xff] }
  0x34   :  { %284 = vmatprep.subr.mxu1 %v239_v61  ;;  %478 = vmatprep.subr.mxu0 %v361_v35  ;;  %v339_v48 = vld [vmem:[%s812_s5 + $0x30] sm:$0xff]  ;;  %v338_v50 = vld [vmem:[%s812_s5 + $0x28] sm:$0xff]  ;;  %v353_v51 = vld [vmem:[%s812_s5 + $0xa0] sm:$0xff] }
  0x35   :  { %285 = vmatpush2.msra.mxu1 %v238_v62  ;;  %479 = vmatpush3.msra.mxu0 %v345_v36  ;;  %v337_v52 = vld [vmem:[%s812_s5 + $0x20] sm:$0xff] }
  0x36   :  { %286 = vmatprep.subr.mxu1 %v237_v63  ;;  %480 = vmatprep.subr.mxu0 %v360_v37  ;;  %v69_v56 = vld [vmem:[%s809_s2] sm:$0x3] }
  0x37   :  { %287 = vmatpush2.msra.mxu1 %v236_v0  ;;  %481 = vmatpush3.msra.mxu0 %v344_v38  ;;  %v74_v58 = vrot.slane %v69_v56, %v73_v55  ;;  %v78_v59 = vrot.slane %v69_v56, %v77_v57  ;;  %v471_v32 = vld [vmem:[%s813_s6] ss:$0 sm:$0xff] }
  0x38   :  { %288 = vmatprep.subr.mxu1 %v235_v1  ;;  %482 = vmatprep.subr.mxu0 %v359_v39 }
  0x39   :  { %289 = vmatpush2.msra.mxu1 %v234_v2  ;;  %483 = vmatpush3.msra.mxu0 %v343_v40 }
  0x3a   :  { %290 = vmatprep.subr.mxu1 %v233_v3  ;;  %484 = vmatprep.subr.mxu0 %v358_v41 }
  0x3b   :  { %291 = vmatpush2.msra.mxu1 %v232_v4  ;;  %485 = vmatpush3.msra.mxu0 %v342_v42 }
  0x3c   :  { %292 = vmatprep.subr.mxu1 %v231_v5  ;;  %486 = vmatprep.subr.mxu0 %v357_v43 }
  0x3d   :  { %293 = vmatpush2.msra.mxu1 %v230_v6  ;;  %487 = vmatpush3.msra.mxu0 %v341_v44 }
  0x3e   :  { %294 = vmatprep.subr.mxu1 %v229_v7  ;;  %488 = vmatprep.subr.mxu0 %v356_v45 }
  0x3f   :  { %295 = vmatpush2.msra.mxu1 %v228_v8  ;;  %489 = vmatpush3.msra.mxu0 %v340_v46  ;;  %v352_v8 = vld [vmem:[%s812_s5 + $0x98] sm:$0xff] }
  0x40   :  { %296 = vmatprep.subr.mxu1 %v227_v9  ;;  %490 = vmatprep.subr.mxu0 %v355_v47  ;;  %v336_v9 = vld [vmem:[%s812_s5 + $0x18] sm:$0xff] }
  0x41   :  { %297 = vmatpush2.msra.mxu1 %v226_v10  ;;  %491 = vmatpush3.msra.mxu0 %v339_v48  ;;  %v351_v10 = vld [vmem:[%s812_s5 + $0x90] sm:$0xff] }
  0x42   :  { %298 = vmatprep.subr.mxu1 %v225_v11  ;;  %492 = vmatprep.subr.mxu0 %v354_v49  ;;  %v335_v11 = vld [vmem:[%s812_s5 + $0x10] sm:$0xff] }
  0x43   :  { %299 = vmatpush2.msra.mxu1 %v224_v12  ;;  %493 = vmatpush3.msra.mxu0 %v338_v50  ;;  %v350_v12 = vld [vmem:[%s812_s5 + $0x88] sm:$0xff] }
  0x44   :  { %300 = vmatprep.subr.mxu1 %v223_v13  ;;  %494 = vmatprep.subr.mxu0 %v353_v51  ;;  %v334_v13 = vld [vmem:[%s812_s5 + $0x8] sm:$0xff] }
  0x45   :  { %301 = vmatpush2.msra.mxu1 %v222_v14  ;;  %495 = vmatpush3.msra.mxu0 %v337_v52  ;;  %v349_v14 = vld [vmem:[%s812_s5 + $0x80] sm:$0xff] }
  0x46   :  { %302 = vmatprep.subr.mxu1 %v221_v15  ;;  %496 = vmatprep.subr.mxu0 %v352_v8  ;;  %v333_v15 = vld [vmem:[%s812_s5] sm:$0xff] }
  0x47   :  { %303 = vmatpush2.msra.mxu1 %v220_v16  ;;  %497 = vmatpush3.msra.mxu0 %v336_v9  ;;  %v240_v16 = vld [vmem:[%s811_s4] sm:$0x3] }
  0x48   :  { %304 = vmatprep.subr.mxu1 %v219_v17  ;;  %498 = vmatprep.subr.mxu0 %v351_v10  ;;  %v245_v17 = vrot.slane %v240_v16, %v73_v55 }
  0x49   :  { %305 = vmatpush2.msra.mxu1 %v218_v18  ;;  %499 = vmatpush3.msra.mxu0 %v335_v11  ;;  %v249_v18 = vrot.slane %v240_v16, %v77_v57 }
  0x4a   :  { %306 = vmatprep.subr.mxu1 %v217_v19  ;;  %500 = vmatprep.subr.mxu0 %v350_v12 }
  0x4b   :  { %307 = vmatpush2.msra.mxu1 %v216_v20  ;;  %501 = vmatpush3.msra.mxu0 %v334_v13 }
  0x4c   :  { %308 = vmatprep.subr.mxu1 %v215_v21  ;;  %502 = vmatprep.subr.mxu0 %v349_v14 }
  0x4d   :  { %309 = vmatpush2.msra.mxu1 %v214_v22  ;;  %503 = vmatpush3.msra.mxu0 %v333_v15 }
  0x4e   :  { %310 = vmatprep.subr.mxu1 %v213_v23 }
  0x4f   :  { %311 = vmatpush2.msra.mxu1 %v212_v24 }
  0x50   :  { %312 = vmatprep.subr.mxu1 %v211_v25 }
  0x51   :  { %313 = vmatpush2.msra.mxu1 %v210_v26 }
  0x52   :  { %314 = vmatprep.subr.mxu1 %v209_v27 }
  0x53   :  { %315 = vmatpush2.msra.mxu1 %v208_v28 }
  0xe9   :  { %v161_v60 = vpop.f32.mrf.mxu0 }
  0xea   :  { %v162_v61 = vadd.f32 %v161_v60, %v74_v58 }
  0xeb   :  { %v163_v62 = vpop.f32.mrf.mxu0 }
  0xec   :  { %v164_v63 = vadd.f32 %v163_v62, %v78_v59  ;;  %v172_v2 = vmax.f32 %v162_v61, 0.0 }
  0xed   :  { %v167_v0 = vpop.f32.mrf.mxu0 }
  0xee   :  { %v173_v1 = vmax.f32 %v164_v63, 0.0  ;;  %v168_v3 = vadd.f32 %v167_v0, %v74_v58 }
  0xef   :  { %v169_v4 = vpop.f32.mrf.mxu0 }
  0xf0   :  { %v170_v5 = vadd.f32 %v169_v4, %v78_v59  ;;  %316 = vmatprep.mubr.f32.mxu1 %v173_v1  ;;  %v174_v7 = vmax.f32 %v168_v3, 0.0 }
  0xf1   :  { %317 = vmatmul.mubr.f32.vlgmr.msra.gmra.mxu1 %v172_v2 }
  0xf2   :  { %v175_v6 = vmax.f32 %v170_v5, 0.0 }
  0xf4   :  { %322 = vmatprep.mubr.f32.mxu1 %v175_v6 }
  0xf5   :  { %323 = vmatmul.mubr.f32.gmra.mxu1 %v174_v7 }
 0x1b1   :  { %v318_v19 = vpop.f32.mrf.mxu1 }
 0x1b2   :  { %v319_v20 = vadd.f32 %v318_v19, %v245_v17 }
 0x1b3   :  { %v320_v21 = vpop.f32.mrf.mxu1 }
 0x1b4   :  { %v321_v22 = vadd.f32 %v320_v21, %v249_v18  ;;  %v329_v25 = vmax.f32 %v319_v20, 0.0 }
 0x1b5   :  { %v324_v23 = vpop.f32.mrf.mxu1 }
 0x1b6   :  { %v330_v24 = vmax.f32 %v321_v22, 0.0  ;;  %v325_v26 = vadd.f32 %v324_v23, %v245_v17 }
 0x1b7   :  { %v326_v27 = vpop.f32.mrf.mxu1 }
 0x1b8   :  { %v327_v28 = vadd.f32 %v326_v27, %v249_v18  ;;  %436 = vmatprep.mubr.f32.mxu0 %v330_v24  ;;  %v331_v30 = vmax.f32 %v325_v26, 0.0 }
 0x1b9   :  { %437 = vmatmul.mubr.f32.vlgmr.msra.gmra.mxu0 %v329_v25 }
 0x1ba   :  { %v332_v29 = vmax.f32 %v327_v28, 0.0 }
 0x1bc   :  { %441 = vmatprep.mubr.f32.mxu0 %v332_v29 }
 0x1bd   :  { %442 = vmatmul.mubr.f32.gmra.mxu0 %v331_v30 }
 0x279   :  { %v504_v31 = vpop.f32.mrf.mxu0 }
 0x27b   :  { %v505_v33 = vpop.f32.mrf.mxu0 }
 0x27c   :  { %v506_v34 = vadd.f32 %v505_v33, %v504_v31 }
 0x27d   :  { %v507_v35 = vpop.f32.mrf.mxu0 }
 0x27e   :  { %v439_v36 = vadd.f32 %v506_v34, %v471_v32 }
 0x27f   :  { %v508_v37 = vpop.f32.mrf.mxu0 }
 0x280   :  { %448 = vst.msk [vmem:[#allocation5] sm:$0xff] %vm447_vm2, %v439_v36  ;;  %v509_v38 = vadd.f32 %v508_v37, %v507_v35 }
 0x282   :  { %v444_v39 = vadd.f32 %v509_v38, %v471_v32 }
 0x284   :  { %449 = vst.msk [vmem:[#allocation5 + $0x8] sm:$0xff] %vm447_vm2, %v444_v39 }
 0x285   :  { %548 = shalt.err (!%p545_p9)
}
 0x286   :  { %s566_s6 = smov 128   ;;  %s567_s8 = smov 8  }
 0x287   :  { %461 = dma.vmem_to_hbm [thread:$0]  %s456_s29, 256, %s814_s7, [#allocation4], %s566_s6, %s566_s6, %s567_s8  }
 0x288   :  { %559 = dma.done.wait [#allocation4], 256  }
 0x289   :  { %560 = vsyncadd [#allocation4], 4294967040 }
 0x28a   :  { %465 = vsyncpa [#allocation3], 1 }
 0x28b   :  { %466 = vsyncpa [#allocation4], 1 }

</bundles_post_ra>
